<compile_context>
chip_gen: v5e
topology: v5e:2x2
jax: 0.10.0
libtpu: 0.0.40
codegen_flags: <defaults>
</compile_context>

<pallas_src>
import functools

import jax
import jax.numpy as jnp
from jax import lax
from jax.experimental import pallas as pl
from jax.experimental.pallas import tpu as pltpu


def _round_up(v, m):
    return ((v + m - 1) // m) * m


def _erf(z):
    # Abramowitz & Stegun 7.1.26 rational approximation, |error| < 1.5e-7.
    a1, a2, a3, a4, a5 = (0.254829592, -0.284496736, 1.421413741,
                          -1.453152027, 1.061405429)
    p = 0.3275911
    sgn = jnp.where(z >= 0.0, 1.0, -1.0)
    az = jnp.abs(z)
    # approx reciprocal -> EUP slot instead of a multi-op VALU divide sequence.
    t = pl.reciprocal(1.0 + p * az, approx=True)
    poly = t * (a1 + t * (a2 + t * (a3 + t * (a4 + t * a5))))
    return sgn * (1.0 - poly * jnp.exp(-az * az))


def _gelu_exact(x):
    # Exact (erf-based) GELU, matching PyTorch nn.GELU() default.
    return 0.5 * x * (1.0 + _erf(x * 0.7071067811865476))


def ffn_kernel(x_ref, gamma_ref, beta_ref, w1_ref, b1_ref, w2_ref, b2_ref,
               o_ref, *scratch, eps, d_valid, acc_in_out):
    if acc_in_out:
        (xn_ref,) = scratch
        acc_ref = o_ref                       # accumulate straight into the f32 output
    else:
        xn_ref, acc_ref = scratch

    hk = pl.program_id(1)                     # hidden-dim tile index (inner axis)

    # ---- LayerNorm (f32) once per row tile; cache bf16 copy for the MXU -----
    @pl.when(hk == 0)
    def _init():
        x = x_ref[...].astype(jnp.float32)                      # (bm, Dp)
        dp = x.shape[-1]
        if d_valid == dp:
            mean = jnp.mean(x, axis=-1, keepdims=True)
            xc = x - mean
            var = jnp.mean(xc * xc, axis=-1, keepdims=True)     # biased (PyTorch LN)
        else:
            # D was padded up to a lane-dense multiple of 128: mask the pad
            # columns so the LN statistics match the original feature dim.
            col = lax.broadcasted_iota(jnp.int32, x.shape, 1)
            mask = col < d_valid
            inv_d = 1.0 / d_valid
            xs = jnp.where(mask, x, 0.0)
            mean = jnp.sum(xs, axis=-1, keepdims=True) * inv_d
            xc = jnp.where(mask, x - mean, 0.0)
            var = jnp.sum(xc * xc, axis=-1, keepdims=True) * inv_d
        xn = xc * lax.rsqrt(var + eps) * gamma_ref[...] + beta_ref[...]
        xn_ref[...] = xn.astype(xn_ref.dtype)                   # bf16 cache
        acc_ref[...] = jnp.zeros_like(acc_ref)

    # ---- Linear1 tile + GELU: (bm, Dp) @ (Dp, bh)  (bf16 x bf16 -> f32) -----
    h = jnp.dot(xn_ref[...], w1_ref[...], preferred_element_type=jnp.float32)
    h = _gelu_exact(h + b1_ref[...])                            # f32 (bm, bh)

    # ---- Linear2 partial: (bm, bh) @ (bh, Dp), accumulate in f32 ------------
    acc_ref[...] += jnp.dot(h.astype(jnp.bfloat16), w2_ref[...],
                            preferred_element_type=jnp.float32)

    @pl.when(hk == pl.num_programs(1) - 1)
    def _finalize():
        o_ref[...] = (acc_ref[...].astype(jnp.float32)
                      + b2_ref[...]).astype(o_ref.dtype)


def _vmem_capacity_bytes():
    try:
        return int(pltpu.get_tpu_info().vmem_capacity_bytes)
    except Exception:
        kind = jax.devices()[0].device_kind.lower()
        # v7x has 64 MiB / TensorCore; v5e & v6e have 128 MiB.
        return (64 << 20) if "v7" in kind else (128 << 20)


def feedforward_block(x, params, *, eps=1e-5):
    B, N, D = x.shape
    H = params["w1"].shape[0]
    M = B * N
    out_dtype = x.dtype

    kind = jax.devices()[0].device_kind.lower()
    vmem_cap = _vmem_capacity_bytes()
    vmem_budget = vmem_cap * 3 // 4            # headroom for Mosaic internal scratch

    # ---- lane-dense feature dim ---------------------------------------------
    Dp = _round_up(D, 128)

    # ---- row tiling (flatten (B, N) -> M rows) ------------------------------
    if M <= 256:
        bm = _round_up(M, 8)
        m_pad = bm
    else:
        # v6e: big VMEM + high ridge -> larger row tile when weights stream.
        bm = 512 if ("v6" in kind and vmem_cap >= (96 << 20)) else 256
        m_pad = _round_up(M, bm)

    x2 = x.reshape(M, D)
    if m_pad != M or Dp != D:
        x2 = jnp.pad(x2, ((0, m_pad - M), (0, Dp - D)))

    # ---- VMEM accounting for hidden-dim tile selection ----------------------
    acc_in_out = jnp.dtype(out_dtype) == jnp.dtype(jnp.float32)
    itm_in = jnp.dtype(x.dtype).itemsize
    itm_out = jnp.dtype(out_dtype).itemsize
    act_bytes = (2 * bm * Dp * itm_in          # x tile (double-buffered)
                 + 2 * bm * Dp * itm_out       # output tile (double-buffered)
                 + bm * Dp * 2                 # bf16 LN cache
                 + (0 if acc_in_out else bm * Dp * 4))
    avail = max(vmem_budget - act_bytes - (2 << 20), 0)

    def weight_cost(bh):                       # 2 mats x 2 buffers x 2 B (bf16)
        return 8 * Dp * bh

    Hp128 = _round_up(H, 128)
    if weight_cost(Hp128) <= avail:
        # Fast path: full weight residency -> hidden grid axis has extent 1,
        # weight block indices never change, weights DMAed from HBM once.
        bh = Hp128
        Hp = Hp128
    else:
        bh = 128
        for cand in (4096, 2048, 1024, 512, 256):
            if cand <= Hp128 and weight_cost(cand) <= avail:
                bh = cand
                break
        Hp = _round_up(H, bh)

    # ---- params: pre-transposed to (in, out), bf16 for the MXU, zero-padded -
    gamma = jnp.pad(params["ln_gamma"].astype(jnp.float32), (0, Dp - D)).reshape(1, Dp)
    beta = jnp.pad(params["ln_beta"].astype(jnp.float32), (0, Dp - D)).reshape(1, Dp)
    w1_t = jnp.pad(params["w1"].T.astype(jnp.bfloat16),
                   ((0, Dp - D), (0, Hp - H)))                   # (Dp, Hp)
    b1 = jnp.pad(params["b1"].astype(jnp.float32), (0, Hp - H)).reshape(1, Hp)
    w2_t = jnp.pad(params["w2"].T.astype(jnp.bfloat16),
                   ((0, Hp - H), (0, Dp - D)))                   # (Hp, Dp)
    b2 = jnp.pad(params["b2"].astype(jnp.float32), (0, Dp - D)).reshape(1, Dp)

    scratch = [pltpu.VMEM((bm, Dp), jnp.bfloat16)]               # cached LN output
    if not acc_in_out:
        scratch.append(pltpu.VMEM((bm, Dp), jnp.float32))        # f32 accumulator

    est_total = act_bytes + weight_cost(bh) + (4 << 20)
    vmem_limit = int(min(vmem_cap - (4 << 20), max(32 << 20, est_total + (8 << 20))))

    kernel = functools.partial(ffn_kernel, eps=eps, d_valid=D,
                               acc_in_out=bool(acc_in_out))
    grid = (m_pad // bm, Hp // bh)

    out = pl.pallas_call(
        kernel,
        out_shape=jax.ShapeDtypeStruct((m_pad, Dp), out_dtype),
        grid_spec=pltpu.PrefetchScalarGridSpec(
            num_scalar_prefetch=0,
            grid=grid,
            in_specs=[
                pl.BlockSpec((bm, Dp), lambda i, k: (i, 0)),     # x rows
                pl.BlockSpec((1, Dp), lambda i, k: (0, 0)),      # LN gamma
                pl.BlockSpec((1, Dp), lambda i, k: (0, 0)),      # LN beta
                pl.BlockSpec((Dp, bh), lambda i, k: (0, k)),     # W1^T tile
                pl.BlockSpec((1, bh), lambda i, k: (0, k)),      # b1 tile
                pl.BlockSpec((bh, Dp), lambda i, k: (k, 0)),     # W2^T tile
                pl.BlockSpec((1, Dp), lambda i, k: (0, 0)),      # b2
            ],
            out_specs=pl.BlockSpec((bm, Dp), lambda i, k: (i, 0)),
            scratch_shapes=scratch,
        ),
        compiler_params=pltpu.CompilerParams(
            dimension_semantics=("parallel", "arbitrary"),
            vmem_limit_bytes=vmem_limit,
        ),
    )(x2, gamma, beta, w1_t, b1, w2_t, b2)

    return out[:M, :D].reshape(B, N, D)


def feedforward_block_ref(x, params, *, eps=1e-5):
    """Pure-JAX f32 reference matching the PyTorch forward."""
    mean = jnp.mean(x, axis=-1, keepdims=True)
    var = jnp.mean((x - mean) ** 2, axis=-1, keepdims=True)
    xn = (x - mean) / jnp.sqrt(var + eps) * params["ln_gamma"] + params["ln_beta"]
    h = jnp.einsum("bnd,hd->bnh", xn, params["w1"]) + params["b1"]
    h = jax.nn.gelu(h, approximate=False)
    return jnp.einsum("bnh,dh->bnd", h, params["w2"]) + params["b2"]


def make_params(key, dim, hidden):
    ks = jax.random.split(key, 6)
    scale = 0.05
    return {
        "ln_gamma": 1.0 + 0.1 * jax.random.normal(ks[0], (dim,), jnp.float32),
        "ln_beta": 0.1 * jax.random.normal(ks[1], (dim,), jnp.float32),
        "w1": scale * jax.random.normal(ks[2], (hidden, dim), jnp.float32),
        "b1": scale * jax.random.normal(ks[3], (hidden,), jnp.float32),
        "w2": scale * jax.random.normal(ks[4], (dim, hidden), jnp.float32),
        "b2": scale * jax.random.normal(ks[5], (dim,), jnp.float32),
    }


if __name__ == "__main__":
    B, N, D, mlp_factor = 2, 8, 32, 4
    H = int(D * mlp_factor)                      # 128

    key = jax.random.PRNGKey(0)
    kx, kp = jax.random.split(key)
    x = jax.random.normal(kx, (B, N, D), jnp.float32)
    params = make_params(kp, D, H)

    out = feedforward_block(x, params)
    out = jax.block_until_ready(out)

    ref = feedforward_block_ref(x, params)
    assert out.shape == (B, N, D)
    max_err = float(jnp.max(jnp.abs(out - ref)))
    # bf16 MXU operands vs. pure-f32 reference -> allow small mixed-precision slack.
    assert jnp.allclose(out, ref, atol=2e-2, rtol=2e-2), \
        f"mismatch vs reference (max abs err {max_err})"

    print("KERNEL_OK")
</pallas_src>

<mosaic_0001>
module attributes {stable_mosaic.version = 11 : i64} {
  func.func @ffn_kernel(%arg0: i32, %arg1: i32, %arg2: memref<16x128xf32, #tpu.memory_space<vmem>>, %arg3: memref<1x128xf32, #tpu.memory_space<vmem>>, %arg4: memref<1x128xf32, #tpu.memory_space<vmem>>, %arg5: memref<128x128xbf16, #tpu.memory_space<vmem>>, %arg6: memref<1x128xf32, #tpu.memory_space<vmem>>, %arg7: memref<128x128xbf16, #tpu.memory_space<vmem>>, %arg8: memref<1x128xf32, #tpu.memory_space<vmem>>, %arg9: memref<16x128xf32, #tpu.memory_space<vmem>>, %arg10: memref<16x128xbf16, #tpu.memory_space<vmem>>) attributes {dimension_semantics = [#tpu.dimension_semantics<parallel>, #tpu.dimension_semantics<arbitrary>], iteration_bounds = array<i64: 1, 1>, scalar_prefetch = 0 : i64, scratch_operands = 1 : i64, tpu.core_type = #tpu.core_type<tc>, window_params = [{transform_indices = @transform_0, window_bounds = array<i64: 16, 128>}, {pipeline_mode = #tpu.pipeline_mode<synchronous>, transform_indices = @transform_1, window_bounds = array<i64: 1, 128>}, {pipeline_mode = #tpu.pipeline_mode<synchronous>, transform_indices = @transform_2, window_bounds = array<i64: 1, 128>}, {transform_indices = @transform_3, window_bounds = array<i64: 128, 128>}, {transform_indices = @transform_4, window_bounds = array<i64: 1, 128>}, {transform_indices = @transform_5, window_bounds = array<i64: 128, 128>}, {pipeline_mode = #tpu.pipeline_mode<synchronous>, transform_indices = @transform_6, window_bounds = array<i64: 1, 128>}, {transform_indices = @transform_7, window_bounds = array<i64: 16, 128>}]} {
    %c0_i32 = arith.constant 0 : i32
    %0 = arith.cmpi eq, %arg1, %c0_i32 : i32
    %1 = arith.extui %0 : i1 to i32
    %c0_i32_0 = arith.constant 0 : i32
    %2 = arith.cmpi ne, %1, %c0_i32_0 : i32
    scf.if %2 {
      %c0_30 = arith.constant 0 : index
      %c0_31 = arith.constant 0 : index
      %58 = vector.load %arg2[%c0_30, %c0_31] : memref<16x128xf32, #tpu.memory_space<vmem>>, vector<16x128xf32>
      %59 = tpu.iota {dimensions = array<i32: 1>} : vector<16x128xi32>
      %c32_i32 = arith.constant 32 : i32
      %60 = vector.broadcast %c32_i32 : i32 to vector<16x128xi32>
      %61 = arith.cmpi slt, %59, %60 : vector<16x128xi32>
      %cst_32 = arith.constant 0.000000e+00 : f32
      %62 = vector.broadcast %cst_32 : f32 to vector<16x128xf32>
      %63 = arith.select %61, %58, %62 : vector<16x128xi1>, vector<16x128xf32>
      %cst_33 = arith.constant dense<0.000000e+00> : vector<16xf32>
      %64 = vector.multi_reduction <add>, %63, %cst_33 [1] : vector<16x128xf32> to vector<16xf32>
      %65 = vector.shape_cast %64 : vector<16xf32> to vector<16x1xf32>
      %cst_34 = arith.constant 3.125000e-02 : f32
      %66 = vector.broadcast %cst_34 : f32 to vector<16x1xf32>
      %67 = arith.mulf %65, %66 : vector<16x1xf32>
      %68 = vector.broadcast %67 : vector<16x1xf32> to vector<16x128xf32>
      %69 = arith.subf %58, %68 : vector<16x128xf32>
      %cst_35 = arith.constant 0.000000e+00 : f32
      %70 = vector.broadcast %cst_35 : f32 to vector<16x128xf32>
      %71 = arith.select %61, %69, %70 : vector<16x128xi1>, vector<16x128xf32>
      %72 = arith.mulf %71, %71 : vector<16x128xf32>
      %cst_36 = arith.constant dense<0.000000e+00> : vector<16xf32>
      %73 = vector.multi_reduction <add>, %72, %cst_36 [1] : vector<16x128xf32> to vector<16xf32>
      %74 = vector.shape_cast %73 : vector<16xf32> to vector<16x1xf32>
      %cst_37 = arith.constant 3.125000e-02 : f32
      %75 = vector.broadcast %cst_37 : f32 to vector<16x1xf32>
      %76 = arith.mulf %74, %75 : vector<16x1xf32>
      %cst_38 = arith.constant 9.99999974E-6 : f32
      %77 = vector.broadcast %cst_38 : f32 to vector<16x1xf32>
      %78 = arith.addf %76, %77 : vector<16x1xf32>
      %79 = math.rsqrt %78 : vector<16x1xf32>
      %80 = vector.broadcast %79 : vector<16x1xf32> to vector<16x128xf32>
      %81 = arith.mulf %71, %80 : vector<16x128xf32>
      %c0_39 = arith.constant 0 : index
      %c0_40 = arith.constant 0 : index
      %82 = vector.load %arg3[%c0_39, %c0_40] : memref<1x128xf32, #tpu.memory_space<vmem>>, vector<1x128xf32>
      %83 = vector.broadcast %82 : vector<1x128xf32> to vector<16x128xf32>
      %84 = arith.mulf %81, %83 : vector<16x128xf32>
      %c0_41 = arith.constant 0 : index
      %c0_42 = arith.constant 0 : index
      %85 = vector.load %arg4[%c0_41, %c0_42] : memref<1x128xf32, #tpu.memory_space<vmem>>, vector<1x128xf32>
      %86 = vector.broadcast %85 : vector<1x128xf32> to vector<16x128xf32>
      %87 = arith.addf %84, %86 : vector<16x128xf32>
      %88 = arith.truncf %87 : vector<16x128xf32> to vector<16x128xbf16>
      %c0_43 = arith.constant 0 : index
      %c0_44 = arith.constant 0 : index
      %89 = vector.load %arg10[%c0_43, %c0_44] : memref<16x128xbf16, #tpu.memory_space<vmem>>, vector<16x128xbf16>
      tpu.vector_store %arg10[%c0_43, %c0_44], %88 {strides = array<i32>} : memref<16x128xbf16, #tpu.memory_space<vmem>>, vector<16x128xbf16>,
      %cst_45 = arith.constant 0.000000e+00 : f32
      %90 = vector.broadcast %cst_45 : f32 to vector<16x128xf32>
      %c0_46 = arith.constant 0 : index
      %c0_47 = arith.constant 0 : index
      %91 = vector.load %arg9[%c0_46, %c0_47] : memref<16x128xf32, #tpu.memory_space<vmem>>, vector<16x128xf32>
      tpu.vector_store %arg9[%c0_46, %c0_47], %90 {strides = array<i32>} : memref<16x128xf32, #tpu.memory_space<vmem>>, vector<16x128xf32>,
    } else {
    }
    %c0 = arith.constant 0 : index
    %c0_1 = arith.constant 0 : index
    %3 = vector.load %arg10[%c0, %c0_1] : memref<16x128xbf16, #tpu.memory_space<vmem>>, vector<16x128xbf16>
    %c0_2 = arith.constant 0 : index
    %c0_3 = arith.constant 0 : index
    %4 = vector.load %arg5[%c0_2, %c0_3] : memref<128x128xbf16, #tpu.memory_space<vmem>>, vector<128x128xbf16>
    %cst = arith.constant dense<0.000000e+00> : vector<16x128xf32>
    %5 = tpu.matmul %3, %4, %cst {dimension_numbers = #tpu.dot_dimension_numbers<[1], [0], [0], [1], [0, 0, 1, 1], [], []>} : vector<16x128xbf16>, vector<128x128xbf16>, vector<16x128xf32> -> vector<16x128xf32>
    %c0_4 = arith.constant 0 : index
    %c0_5 = arith.constant 0 : index
    %6 = vector.load %arg6[%c0_4, %c0_5] : memref<1x128xf32, #tpu.memory_space<vmem>>, vector<1x128xf32>
    %7 = vector.broadcast %6 : vector<1x128xf32> to vector<16x128xf32>
    %8 = arith.addf %5, %7 : vector<16x128xf32>
    %cst_6 = arith.constant 5.000000e-01 : f32
    %9 = vector.broadcast %cst_6 : f32 to vector<16x128xf32>
    %10 = arith.mulf %9, %8 : vector<16x128xf32>
    %cst_7 = arith.constant 0.707106769 : f32
    %11 = vector.broadcast %cst_7 : f32 to vector<16x128xf32>
    %12 = arith.mulf %8, %11 : vector<16x128xf32>
    %cst_8 = arith.constant 0.000000e+00 : f32
    %13 = vector.broadcast %cst_8 : f32 to vector<16x128xf32>
    %14 = arith.cmpf oge, %12, %13 : vector<16x128xf32>
    %cst_9 = arith.constant 1.000000e+00 : f32
    %cst_10 = arith.constant -1.000000e+00 : f32
    %15 = vector.broadcast %cst_9 : f32 to vector<16x128xf32>
    %16 = vector.broadcast %cst_10 : f32 to vector<16x128xf32>
    %17 = arith.select %14, %15, %16 : vector<16x128xi1>, vector<16x128xf32>
    %18 = math.absf %12 : vector<16x128xf32>
    %cst_11 = arith.constant 0.327591091 : f32
    %19 = vector.broadcast %cst_11 : f32 to vector<16x128xf32>
    %20 = arith.mulf %19, %18 : vector<16x128xf32>
    %cst_12 = arith.constant 1.000000e+00 : f32
    %21 = vector.broadcast %cst_12 : f32 to vector<16x128xf32>
    %22 = arith.addf %21, %20 : vector<16x128xf32>
    %23 = tpu.reciprocal %22 {approx = true} : vector<16x128xf32> -> vector<16x128xf32>
    %cst_13 = arith.constant 1.06140542 : f32
    %24 = vector.broadcast %cst_13 : f32 to vector<16x128xf32>
    %25 = arith.mulf %23, %24 : vector<16x128xf32>
    %cst_14 = arith.constant -1.45315206 : f32
    %26 = vector.broadcast %cst_14 : f32 to vector<16x128xf32>
    %27 = arith.addf %26, %25 : vector<16x128xf32>
    %28 = arith.mulf %23, %27 : vector<16x128xf32>
    %cst_15 = arith.constant 1.42141378 : f32
    %29 = vector.broadcast %cst_15 : f32 to vector<16x128xf32>
    %30 = arith.addf %29, %28 : vector<16x128xf32>
    %31 = arith.mulf %23, %30 : vector<16x128xf32>
    %cst_16 = arith.constant -0.284496725 : f32
    %32 = vector.broadcast %cst_16 : f32 to vector<16x128xf32>
    %33 = arith.addf %32, %31 : vector<16x128xf32>
    %34 = arith.mulf %23, %33 : vector<16x128xf32>
    %cst_17 = arith.constant 0.254829586 : f32
    %35 = vector.broadcast %cst_17 : f32 to vector<16x128xf32>
    %36 = arith.addf %35, %34 : vector<16x128xf32>
    %37 = arith.mulf %23, %36 : vector<16x128xf32>
    %cst_18 = arith.constant 0.000000e+00 : f32
    %38 = vector.broadcast %cst_18 : f32 to vector<16x128xf32>
    %39 = arith.subf %38, %18 : vector<16x128xf32>
    %40 = arith.mulf %39, %18 : vector<16x128xf32>
    %41 = math.exp %40 : vector<16x128xf32>
    %42 = arith.mulf %37, %41 : vector<16x128xf32>
    %cst_19 = arith.constant 1.000000e+00 : f32
    %43 = vector.broadcast %cst_19 : f32 to vector<16x128xf32>
    %44 = arith.subf %43, %42 : vector<16x128xf32>
    %45 = arith.mulf %17, %44 : vector<16x128xf32>
    %cst_20 = arith.constant 1.000000e+00 : f32
    %46 = vector.broadcast %cst_20 : f32 to vector<16x128xf32>
    %47 = arith.addf %46, %45 : vector<16x128xf32>
    %48 = arith.mulf %10, %47 : vector<16x128xf32>
    %c0_21 = arith.constant 0 : index
    %c0_22 = arith.constant 0 : index
    %49 = vector.load %arg9[%c0_21, %c0_22] : memref<16x128xf32, #tpu.memory_space<vmem>>, vector<16x128xf32>
    %50 = arith.truncf %48 : vector<16x128xf32> to vector<16x128xbf16>
    %c0_23 = arith.constant 0 : index
    %c0_24 = arith.constant 0 : index
    %51 = vector.load %arg7[%c0_23, %c0_24] : memref<128x128xbf16, #tpu.memory_space<vmem>>, vector<128x128xbf16>
    %cst_25 = arith.constant dense<0.000000e+00> : vector<16x128xf32>
    %52 = tpu.matmul %50, %51, %cst_25 {dimension_numbers = #tpu.dot_dimension_numbers<[1], [0], [0], [1], [0, 0, 1, 1], [], []>} : vector<16x128xbf16>, vector<128x128xbf16>, vector<16x128xf32> -> vector<16x128xf32>
    %53 = arith.addf %49, %52 : vector<16x128xf32>
    %c0_26 = arith.constant 0 : index
    %c0_27 = arith.constant 0 : index
    %54 = vector.load %arg9[%c0_26, %c0_27] : memref<16x128xf32, #tpu.memory_space<vmem>>, vector<16x128xf32>
    tpu.vector_store %arg9[%c0_26, %c0_27], %53 {strides = array<i32>} : memref<16x128xf32, #tpu.memory_space<vmem>>, vector<16x128xf32>,
    %c0_i32_28 = arith.constant 0 : i32
    %55 = arith.cmpi eq, %arg1, %c0_i32_28 : i32
    %56 = arith.extui %55 : i1 to i32
    %c0_i32_29 = arith.constant 0 : i32
    %57 = arith.cmpi ne, %56, %c0_i32_29 : i32
    scf.if %57 {
      %c0_30 = arith.constant 0 : index
      %c0_31 = arith.constant 0 : index
      %58 = vector.load %arg9[%c0_30, %c0_31] : memref<16x128xf32, #tpu.memory_space<vmem>>, vector<16x128xf32>
      %c0_32 = arith.constant 0 : index
      %c0_33 = arith.constant 0 : index
      %59 = vector.load %arg8[%c0_32, %c0_33] : memref<1x128xf32, #tpu.memory_space<vmem>>, vector<1x128xf32>
      %60 = vector.broadcast %59 : vector<1x128xf32> to vector<16x128xf32>
      %61 = arith.addf %58, %60 : vector<16x128xf32>
      %c0_34 = arith.constant 0 : index
      %c0_35 = arith.constant 0 : index
      %62 = vector.load %arg9[%c0_34, %c0_35] : memref<16x128xf32, #tpu.memory_space<vmem>>, vector<16x128xf32>
      tpu.vector_store %arg9[%c0_34, %c0_35], %61 {strides = array<i32>} : memref<16x128xf32, #tpu.memory_space<vmem>>, vector<16x128xf32>,
    } else {
    }
    return
  }
  func.func @transform_0(%arg0: i32, %arg1: i32) -> (i32, i32) {
    %c0_i32 = arith.constant 0 : i32
    %c0_i32_0 = arith.constant 0 : i32
    return %arg0, %c0_i32 : i32, i32
  }
  func.func @transform_1(%arg0: i32, %arg1: i32) -> (i32, i32) {
    %c0_i32 = arith.constant 0 : i32
    %c0_i32_0 = arith.constant 0 : i32
    %c0_i32_1 = arith.constant 0 : i32
    return %c0_i32, %c0_i32_0 : i32, i32
  }
  func.func @transform_2(%arg0: i32, %arg1: i32) -> (i32, i32) {
    %c0_i32 = arith.constant 0 : i32
    %c0_i32_0 = arith.constant 0 : i32
    %c0_i32_1 = arith.constant 0 : i32
    return %c0_i32, %c0_i32_0 : i32, i32
  }
  func.func @transform_3(%arg0: i32, %arg1: i32) -> (i32, i32) {
    %c0_i32 = arith.constant 0 : i32
    %c0_i32_0 = arith.constant 0 : i32
    return %c0_i32, %arg1 : i32, i32
  }
  func.func @transform_4(%arg0: i32, %arg1: i32) -> (i32, i32) {
    %c0_i32 = arith.constant 0 : i32
    %c0_i32_0 = arith.constant 0 : i32
    return %c0_i32, %arg1 : i32, i32
  }
  func.func @transform_5(%arg0: i32, %arg1: i32) -> (i32, i32) {
    %c0_i32 = arith.constant 0 : i32
    %c0_i32_0 = arith.constant 0 : i32
    return %arg1, %c0_i32 : i32, i32
  }
  func.func @transform_6(%arg0: i32, %arg1: i32) -> (i32, i32) {
    %c0_i32 = arith.constant 0 : i32
    %c0_i32_0 = arith.constant 0 : i32
    %c0_i32_1 = arith.constant 0 : i32
    return %c0_i32, %c0_i32_0 : i32, i32
  }
  func.func @transform_7(%arg0: i32, %arg1: i32) -> (i32, i32) {
    %c0_i32 = arith.constant 0 : i32
    %c0_i32_0 = arith.constant 0 : i32
    return %arg0, %c0_i32 : i32, i32
  }
}

</mosaic_0001>

<bundles_post_ra>
// kernel: tpu_custom_call.1
= control target key start
LH: loop header
LB: loop body
LE: loop exit
PB: predicated region body
PF: predicated region fallthrough
CT: control target
= control target key end

     0   :  { %12 = vsyncpa [#allocation4], 0  ;;  %s753_s0 = inlined_call_operand.hbm [shape: f32[16,128], index: 0, kind: input, shape index: {}]   ;;  %s754_s1 = inlined_call_operand.hbm [shape: f32[1,128], index: 1, kind: input, shape index: {}]   ;;  %s755_s2 = inlined_call_operand.vmem [shape: f32[1,128], index: 2, kind: input, shape index: {}]   ;;  %s756_s3 = inlined_call_operand.hbm [shape: bf16[128,128], index: 3, kind: input, shape index: {}]   ;;  %s757_s4 = inlined_call_operand.vmem [shape: f32[1,128], index: 4, kind: input, shape index: {}]   ;;  %s758_s5 = inlined_call_operand.hbm [shape: bf16[128,128], index: 5, kind: input, shape index: {}]   ;;  %s759_s6 = inlined_call_operand.vmem [shape: f32[1,128], index: 6, kind: input, shape index: {}]   ;;  %s760_s7 = inlined_call_operand.hbm [shape: f32[16,128], index: 7, kind: output, shape index: {}]  }
   0x1   :  { %13 = vsyncpa [#allocation7], 0 }
   0x2   :  { %14 = vsyncpa [#allocation10], 0  ;;  %s34_s26 = sshll.u32 %s754_s1, 4  ;;  %s35_s26 = int_to_ptr.hbm [resolvable:$true] %s34_s26 }
   0x3   :  { %15 = vsyncpa [#allocation5], 0  ;;  %s665_s27 = smov [#allocation6]   ;;  %s20_s8 = sshll.u32 %s753_s0, 4  ;;  %s21_s8 = int_to_ptr.hbm [resolvable:$true] %s20_s8 }
   0x4   :  { %s36_s28 = sshll.u32 %s665_s27, 4  ;;  %s666_s9 = smov [#allocation3]   ;;  %s37_s28 = int_to_ptr.vmem [resolvable:$true] %s36_s28 }
   0x5   :  { %39 = dma.hbm_to_vmem [thread:$0]  %s35_s26, 16, %s37_s28, [#allocation7]  }
   0x6   :  { %s22_s10 = sshll.u32 %s666_s9, 4  ;;  %s667_s11 = smov 128   ;;  %s23_s10 = int_to_ptr.vmem [resolvable:$true] %s22_s10 }
   0x7   :  { %s668_s12 = smov 8   ;;  %s46_s14 = sshll.u32 %s756_s3, 4  ;;  %s47_s14 = int_to_ptr.hbm [resolvable:$true] %s46_s14 }
   0x8   :  { %28 = dma.hbm_to_vmem [thread:$0]  %s21_s8, 256, %s23_s10, [#allocation4], %s667_s11, %s667_s11, %s668_s12  }
   0x9   :  { %s669_s15 = smov [#allocation8]   ;;  %s61_s18 = sshll.u32 %s758_s5, 4  ;;  %s62_s18 = int_to_ptr.hbm [resolvable:$true] %s61_s18 }
   0xa   :  { %s48_s16 = sshll.u32 %s669_s15, 4  ;;  %s670_s19 = smov 64   ;;  %s49_s16 = int_to_ptr.vmem [resolvable:$true] %s48_s16 }
   0xb   :  { %s671_s20 = smov 4   ;;  %s672_s21 = smov [#allocation9]  }
   0xc   :  { %54 = dma.hbm_to_vmem [thread:$0]  %s47_s14, 1024, %s49_s16, [#allocation7], %s670_s19, %s670_s19, %s671_s20  }
   0xd   :  { %s63_s22 = sshll.u32 %s672_s21, 4  ;;  %s64_s22 = int_to_ptr.vmem [resolvable:$true] %s63_s22 }
   0xe   :  { %69 = dma.hbm_to_vmem [thread:$0]  %s62_s18, 1024, %s64_s22, [#allocation10], %s670_s19, %s670_s19, %s671_s20  }
   0xf   :  { %657 = dma.done.wait [#allocation4], 256  }
  0x10   :  { %658 = vsyncadd [#allocation4], 4294967040 }
  0x11   :  { %659 = dma.done.wait [#allocation7], 1040  }
  0x12   :  { %660 = vsyncadd [#allocation7], 4294966256 }
  0x13   :  { %661 = dma.done.wait [#allocation10], 1024  }
  0x14   :  { %662 = vsyncadd [#allocation10], 4294966272  ;;  %v94_v0 = vlaneseq  ;;  %v92_v2 = vld [vmem:[#allocation3] sm:$0xff]  ;;  %v93_v4 = vld [vmem:[#allocation3 + $0x8] sm:$0xff]  ;;  %s674_s25 = smov [#allocation11]   ;;  %s405_s29 = sshll.u32 %s760_s7, 4  ;;  %s406_s29 = int_to_ptr.hbm [resolvable:$true] %s405_s29 }
  0x15   :  { %v496_v16 = vld [vmem:[#allocation8 + $0x38] sm:$0xff]  ;;  %v495_v17 = vld [vmem:[#allocation8 + $0x30] sm:$0xff]  ;;  %v494_v18 = vld [vmem:[#allocation8 + $0x28] sm:$0xff]  ;;  %s403_s26 = sshll.u32 %s674_s25, 4  ;;  %s404_s26 = int_to_ptr.vmem [resolvable:$true] %s403_s26 }
  0x16   :  { %v95_v1 = vand.u32 127, %v94_v0  ;;  %235 = vmatpush.bf16.msra.mxu0 %v496_v16  ;;  %v493_v19 = vld [vmem:[#allocation8 + $0x20] sm:$0xff]  ;;  %v492_v20 = vld [vmem:[#allocation8 + $0x18] sm:$0xff]  ;;  %v491_v24 = vld [vmem:[#allocation8 + $0x10] sm:$0xff] }
  0x17   :  { %v490_v25 = vld [vmem:[#allocation8 + $0x8] sm:$0xff]  ;;  %v489_v28 = vld [vmem:[#allocation8] sm:$0xff]  ;;  %v521_v42 = vld [vmem:[#allocation6] ss:$0 sm:$0xff] }
  0x18   :  { %vm96_vm0 = vcmp.lt.s32.totalorder %v95_v1, 32  ;;  %v522_v46 = vld [vmem:[%s755_s2] ss:$0 sm:$0xff]  ;;  %v504_v54 = vld [vmem:[#allocation9 + $0x38] sm:$0xff]  ;;  %v503_v55 = vld [vmem:[#allocation9 + $0x30] sm:$0xff] }
  0x19   :  { %v97_v3 = vsel %vm96_vm0, %v92_v2, 0.0  ;;  %v98_v5 = vsel %vm96_vm0, %v93_v4, 0.0  ;;  %368 = vmatpush.bf16.msra.mxu1 %v504_v54  ;;  %v502_v56 = vld [vmem:[#allocation9 + $0x28] sm:$0xff]  ;;  %v523_v57 = vld [vmem:[%s757_s4] ss:$0 sm:$0xff]  ;;  %v500_v62 = vld [vmem:[#allocation9 + $0x18] sm:$0xff] }
  0x1a   :  { %99 = vadd.xlane.f32.xlu0 %v97_v3  ;;  %236 = vmatpush.bf16.msra.mxu0 %v495_v17  ;;  %v501_v58 = vld [vmem:[#allocation9 + $0x20] sm:$0xff]  ;;  %v499_v1 = vld [vmem:[#allocation9 + $0x10] sm:$0xff] }
  0x1d   :  { %369 = vmatpush.bf16.msra.mxu1 %v503_v55  ;;  %v524_v55 = vld [vmem:[%s759_s6] ss:$0 sm:$0xff] }
  0x1e   :  { %237 = vmatpush.bf16.msra.mxu0 %v494_v18 }
  0x21   :  { %370 = vmatpush.bf16.msra.mxu1 %v502_v56 }
  0x22   :  { %101 = vadd.xlane.f32.xlu0 %v98_v5  ;;  %238 = vmatpush.bf16.msra.mxu0 %v493_v19 }
  0x25   :  { %371 = vmatpush.bf16.msra.mxu1 %v501_v58 }
  0x26   :  { %239 = vmatpush.bf16.msra.mxu0 %v492_v20 }
  0x29   :  { %372 = vmatpush.bf16.msra.mxu1 %v500_v62 }
  0x2a   :  { %240 = vmatpush.bf16.msra.mxu0 %v491_v24 }
  0x2d   :  { %373 = vmatpush.bf16.msra.mxu1 %v499_v1 }
  0x2e   :  { %241 = vmatpush.bf16.msra.mxu0 %v490_v25 }
  0x32   :  { %242 = vmatpush.bf16.msra.mxu0 %v489_v28 }
  0x8d   :  { %v100_v6 = vpop.xlane.xlu0 %99 }
  0x8e   :  { %v103_v7 = vmul.f32 0.03125, %v100_v6  ;;  %v498_v6 = vld [vmem:[#allocation9 + $0x8] sm:$0xff] }
  0x8f   :  { %374 = vmatpush.bf16.msra.mxu1 %v498_v6 }
  0x90   :  { %v105_v8 = vsub.f32 %v92_v2, %v103_v7 }
  0x92   :  { %v107_v9 = vsel %vm96_vm0, %v105_v8, 0.0 }
  0x93   :  { %v109_v10 = vmul.f32 %v107_v9, %v107_v9 }
  0x95   :  { %111 = vadd.xlane.f32.xlu1 %v109_v10  ;;  %v102_v11 = vpop.xlane.xlu0 %101 }
  0x96   :  { %v104_v12 = vmul.f32 0.03125, %v102_v11 }
  0x98   :  { %v106_v13 = vsub.f32 %v93_v4, %v104_v12 }
  0x9a   :  { %v108_v14 = vsel %vm96_vm0, %v106_v13, 0.0 }
  0x9b   :  { %v110_v15 = vmul.f32 %v108_v14, %v108_v14 }
  0x9d   :  { %113 = vadd.xlane.f32.xlu1 %v110_v15 }
 0x108   :  { %v112_v21 = vpop.xlane.xlu1 %111 }
 0x109   :  { %v115_v22 = vmul.f32 0.03125, %v112_v21 }
 0x10b   :  { %v117_v23 = vadd.f32 1e-05, %v115_v22 }
 0x10d   :  { %525 = vrsqrt.f32 %v117_v23  ;;  %vm125_vm2 = vweird.f32 %v117_v23 }
 0x110   :  { %v114_v26 = vpop.xlane.xlu1 %113 }
 0x111   :  { %v116_v27 = vmul.f32 0.03125, %v114_v26 }
 0x113   :  { %v526_v29 = vpop.eup %525  ;;  %v118_v30 = vadd.f32 1e-05, %v116_v27 }
 0x114   :  { %v120_v31 = vmul.f32 %v526_v29, %v117_v23  ;;  %vm126_vm1 = vweird.f32 %v526_v29 }
 0x115   :  { %527 = vrsqrt.f32 %v118_v30  ;;  %vm127_vm3 = vmor %vm125_vm2, %vm126_vm1  ;;  %vm135_vm5 = vweird.f32 %v118_v30 }
 0x116   :  { %v121_v32 = vmul.f32 %v526_v29, %v120_v31 }
 0x118   :  { %v122_v33 = vmul.f32 0.5, %v121_v32 }
 0x11a   :  { %v123_v34 = vsub.f32 1.5, %v122_v33 }
 0x11b   :  { %v528_v35 = vpop.eup %527 }
 0x11c   :  { %v124_v36 = vmul.f32 %v526_v29, %v123_v34  ;;  %v130_v37 = vmul.f32 %v528_v35, %v118_v30  ;;  %vm136_vm4 = vweird.f32 %v528_v35 }
 0x11d   :  { %vm137_vm6 = vmor %vm135_vm5, %vm136_vm4 }
 0x11e   :  { %v131_v38 = vmul.f32 %v528_v35, %v130_v37  ;;  %v128_v39 = vsel %vm127_vm3, %v526_v29, %v124_v36 }
 0x11f   :  { %v139_v43 = vmul.f32 %v128_v39, %v107_v9  ;;  %v497_v9 = vld [vmem:[#allocation9] sm:$0xff] }
 0x120   :  { %v132_v40 = vmul.f32 0.5, %v131_v38  ;;  %375 = vmatpush.bf16.msra.mxu1 %v497_v9 }
 0x121   :  { %v145_v47 = vmul.f32 %v521_v42, %v139_v43 }
 0x122   :  { %v133_v41 = vsub.f32 1.5, %v132_v40 }
 0x123   :  { %v151_v50 = vadd.f32 %v522_v46, %v145_v47 }
 0x124   :  { %v134_v44 = vmul.f32 %v528_v35, %v133_v41  ;;  %v673_v41 = vmov -1.0  }
 0x126   :  { %v138_v45 = vsel %vm137_vm6, %v528_v35, %v134_v44 }
 0x127   :  { %v140_v48 = vmul.f32 %v138_v45, %v108_v14 }
 0x129   :  { %v146_v49 = vmul.f32 %v521_v42, %v140_v48 }
 0x12b   :  { %v152_v51 = vadd.f32 %v522_v46, %v146_v49 }
 0x12d   :  { %v508_v52 = vpack.c.bf16 %v152_v51, %v151_v50 }
 0x12f   :  { %509 = vst [vmem:[#allocation2] sm:$0xff] %v508_v52  }
 0x136   :  { %v488_v53 = vld [vmem:[#allocation2] sm:$0xff] }
 0x137   :  { %243 = vmatmul.bf16.vlgmr.msra.gmra.mxu0 %v488_v53 }
 0x1b4   :  { %v244_v59 = vpop.f32.mrf.mxu0 }
 0x1b5   :  { %v740_v60 = vadd.f32 %v523_v57, %v244_v59 }
 0x1b7   :  { %v251_v61 = vmul.f32 0.70710677, %v740_v60  ;;  %v249_v49 = vmul.f32 0.5, %v740_v60 }
 0x1b9   :  { %v257_v63 = vand.u32 2147483647, %v251_v61  ;;  %vm253_vm7 = vcmp.ge.f32.partialorder %v251_v61, 0.0 }
 0x1ba   :  { %v255_v42 = vsel %vm253_vm7, 1.0, %v673_v41 }
 0x1bb   :  { %v259_v0 = vmul.f32 0.3275911, %v257_v63  ;;  %v283_v11 = vsub.f32 0.0, %v257_v63 }
 0x1bc   :  { %v246_v2 = vpop.f32.mrf.mxu0 }
 0x1bd   :  { %v261_v3 = vadd.f32 1.0, %v259_v0  ;;  %v247_v4 = vadd.f32 %v523_v57, %v246_v2  ;;  %v285_v15 = vmul.f32 %v283_v11, %v257_v63 }
 0x1bf   :  { %529 = vrcp.f32 %v261_v3  ;;  %v252_v5 = vmul.f32 0.70710677, %v247_v4  ;;  %v287_v19 = vmul.f32 1.442695, %v285_v15  ;;  %v250_v50 = vmul.f32 0.5, %v247_v4 }
 0x1c1   :  { %v258_v7 = vand.u32 2147483647, %v252_v5  ;;  %vm254_vm8 = vcmp.ge.f32.partialorder %v252_v5, 0.0 }
 0x1c2   :  { %v256_v46 = vsel %vm254_vm8, 1.0, %v673_v41 }
 0x1c3   :  { %v260_v8 = vmul.f32 0.3275911, %v258_v7  ;;  %v284_v20 = vsub.f32 0.0, %v258_v7 }
 0x1c5   :  { %v530_v10 = vpop.eup %529  ;;  %v262_v12 = vadd.f32 1.0, %v260_v8  ;;  %v286_v25 = vmul.f32 %v284_v20, %v258_v7 }
 0x1c6   :  { %v265_v13 = vmul.f32 1.0614054, %v530_v10 }
 0x1c7   :  { %531 = vrcp.f32 %v262_v12  ;;  %v289_v30 = vmul.f32 1.442695, %v286_v25 }
 0x1c8   :  { %v267_v14 = vadd.f32 -1.4531521, %v265_v13  ;;  %533 = vpow2.f32 %v287_v19 }
 0x1c9   :  { %535 = vpow2.f32 %v289_v30 }
 0x1ca   :  { %v269_v16 = vmul.f32 %v530_v10, %v267_v14 }
 0x1cc   :  { %v271_v17 = vadd.f32 1.4214138, %v269_v16 }
 0x1cd   :  { %v532_v18 = vpop.eup %531 }
 0x1ce   :  { %v266_v21 = vmul.f32 1.0614054, %v532_v18  ;;  %v273_v22 = vmul.f32 %v530_v10, %v271_v17  ;;  %v534_v33 = vpop.eup %533 }
 0x1cf   :  { %v536_v40 = vpop.eup %535 }
 0x1d0   :  { %v268_v23 = vadd.f32 -1.4531521, %v266_v21  ;;  %v275_v24 = vadd.f32 -0.28449672, %v273_v22 }
 0x1d2   :  { %v270_v26 = vmul.f32 %v532_v18, %v268_v23  ;;  %v277_v27 = vmul.f32 %v530_v10, %v275_v24 }
 0x1d4   :  { %v272_v28 = vadd.f32 1.4214138, %v270_v26  ;;  %v279_v29 = vadd.f32 0.2548296, %v277_v27 }
 0x1d6   :  { %v274_v31 = vmul.f32 %v532_v18, %v272_v28  ;;  %v281_v32 = vmul.f32 %v530_v10, %v279_v29 }
 0x1d8   :  { %v276_v34 = vadd.f32 -0.28449672, %v274_v31  ;;  %v291_v35 = vmul.f32 %v534_v33, %v281_v32 }
 0x1da   :  { %v278_v36 = vmul.f32 %v532_v18, %v276_v34  ;;  %v293_v38 = vsub.f32 1.0, %v291_v35 }
 0x1dc   :  { %v280_v37 = vadd.f32 0.2548296, %v278_v36  ;;  %v295_v44 = vmul.f32 %v293_v38, %v255_v42 }
 0x1de   :  { %v282_v39 = vmul.f32 %v532_v18, %v280_v37  ;;  %v297_v48 = vadd.f32 1.0, %v295_v44 }
 0x1e0   :  { %v292_v43 = vmul.f32 %v536_v40, %v282_v39  ;;  %v299_v52 = vmul.f32 %v297_v48, %v249_v49 }
 0x1e2   :  { %v294_v45 = vsub.f32 1.0, %v292_v43 }
 0x1e4   :  { %v296_v47 = vmul.f32 %v294_v45, %v256_v46 }
 0x1e6   :  { %v298_v51 = vadd.f32 1.0, %v296_v47 }
 0x1e8   :  { %v300_v53 = vmul.f32 %v298_v51, %v250_v50 }
 0x1ea   :  { %v303_v54 = vpack.c.bf16 %v300_v53, %v299_v52 }
 0x1ec   :  { %376 = vmatmul.bf16.vlgmr.msra.gmra.mxu1 %v303_v54 }
 0x269   :  { %v377_v56 = vpop.f32.mrf.mxu1 }
 0x26a   :  { %v395_v57 = vadd.f32 %v524_v55, %v377_v56 }
 0x26c   :  { %397 = vst [vmem:[#allocation11] sm:$0xff] %v395_v57 }
 0x271   :  { %v379_v58 = vpop.f32.mrf.mxu1 }
 0x272   :  { %v396_v59 = vadd.f32 %v524_v55, %v379_v58 }
 0x274   :  { %398 = vst [vmem:[#allocation11 + $0x8] sm:$0xff] %v396_v59 }
 0x275   :  { %411 = dma.vmem_to_hbm [thread:$0]  %s404_s26, 256, %s406_s29, [#allocation5], %s667_s11, %s667_s11, %s668_s12  }
 0x276   :  { %663 = dma.done.wait [#allocation5], 256  }
 0x277   :  { %664 = vsyncadd [#allocation5], 4294967040 }
 0x278   :  { %416 = vsyncpa [#allocation4], 1 }
 0x279   :  { %417 = vsyncpa [#allocation7], 1 }
 0x27a   :  { %418 = vsyncpa [#allocation10], 1 }
 0x27b   :  { %419 = vsyncpa [#allocation5], 1 }

</bundles_post_ra>
